<compile_context>
chip_gen: v7x
topology: tpu7x:2x2x1
jax: 0.10.0
libtpu: 0.0.40
codegen_flags: <defaults>
</compile_context>

<pallas_src>
import functools
import math

import jax
import jax.numpy as jnp
from jax.experimental import pallas as pl
from jax.experimental.pallas import tpu as pltpu


_MAX_ROW_TILE = 512                 # rows per M-tile (512 ~ 85% of HBM roofline on v6e)
_VMEM_LIMIT = 32 * 1024 * 1024


def _row_tile(M):
    # Full-array block when small (block dim == array dim is always legal),
    # otherwise a 512-row tile; Pallas masks the partial last block.
    return M if M <= _MAX_ROW_TILE else _MAX_ROW_TILE


def _seq_tile(T, pref=128):
    # Full-sequence block when small or not tile-divisible, else 128-wide tiles.
    return T if (T <= pref or T % pref != 0) else pref


def _cparams(*sem):
    return pltpu.CompilerParams(dimension_semantics=sem, vmem_limit_bytes=_VMEM_LIMIT)


# ---- Buffered(1) residency probe for grid-invariant weights (v7x VMEM saver) ------------
_BUF1_OK = None


def _buffered_one_supported():
    global _BUF1_OK
    if _BUF1_OK is None:
        try:
            def k(x_ref, o_ref):
                o_ref[...] = x_ref[...]
            spec = pl.BlockSpec((8, 128), lambda i: (0, 0), pipeline_mode=pl.Buffered(1))
            x = jnp.zeros((8, 128), jnp.float32)
            jax.block_until_ready(pl.pallas_call(
                k, out_shape=jax.ShapeDtypeStruct((8, 128), jnp.float32),
                grid=(1,), in_specs=[spec],
                out_specs=pl.BlockSpec((8, 128), lambda i: (0, 0)))(x))
            _BUF1_OK = True
        except Exception:
            _BUF1_OK = False
    return _BUF1_OK


def _const_spec(shape):
    """BlockSpec for grid-invariant operands (weights/biases): single-buffered if supported."""
    zero = (0,) * len(shape)
    if _buffered_one_supported():
        return pl.BlockSpec(shape, lambda *_: zero, pipeline_mode=pl.Buffered(1))
    return pl.BlockSpec(shape, lambda *_: zero)


def _layernorm(x, g, b):
    mu = jnp.mean(x, axis=-1, keepdims=True)
    var = jnp.mean(jnp.square(x - mu), axis=-1, keepdims=True)
    return (x - mu) * jax.lax.rsqrt(var + 1e-5) * g + b


# ----------------------------------------------------------------------------
# Pallas kernels
# ----------------------------------------------------------------------------
def _linear_kernel(x_ref, w_ref, b_ref, *rest, activation, has_residual):
    if has_residual:
        r_ref, o_ref = rest
    else:
        (o_ref,) = rest
    x = x_ref[...].astype(jnp.bfloat16)
    y = jnp.dot(x, w_ref[...].astype(jnp.bfloat16),
                preferred_element_type=jnp.float32) + b_ref[...].astype(jnp.float32)
    if activation == "relu":
        y = jnp.maximum(y, 0.0)
    if has_residual:
        y = y + r_ref[...].astype(jnp.float32)
    o_ref[...] = y.astype(o_ref.dtype)


def linear_pallas(x, w, b, activation=None, residual=None, out_dtype=None):
    """y = act(x @ w + b) [+ residual];  x:(M,K) w:(K,N) b:(1,N).  M-tiled."""
    M, K = x.shape
    N = w.shape[1]
    out_dtype = out_dtype or x.dtype
    TM = _row_tile(M)
    in_specs = [pl.BlockSpec((TM, K), lambda i: (i, 0)),
                _const_spec((K, N)), _const_spec((1, N))]
    args = [x, w, b]
    if residual is not None:
        in_specs.append(pl.BlockSpec((TM, N), lambda i: (i, 0)))
        args.append(residual)
    return pl.pallas_call(
        functools.partial(_linear_kernel, activation=activation,
                          has_residual=residual is not None),
        out_shape=jax.ShapeDtypeStruct((M, N), out_dtype),
        grid=(pl.cdiv(M, TM),),
        in_specs=in_specs,
        out_specs=pl.BlockSpec((TM, N), lambda i: (i, 0)),
        compiler_params=_cparams("parallel"),
    )(*args)


def _ffn_kernel(x_ref, g_ref, lb_ref, w1_ref, b1_ref, w2_ref, b2_ref, o_ref, *, rf):
    x = x_ref[...].astype(jnp.float32)
    h = _layernorm(x, g_ref[...].astype(jnp.float32), lb_ref[...].astype(jnp.float32))
    h = jnp.dot(h.astype(jnp.bfloat16), w1_ref[...].astype(jnp.bfloat16),
                preferred_element_type=jnp.float32) + b1_ref[...].astype(jnp.float32)
    h = h * jax.nn.sigmoid(h)                                   # Swish
    y = jnp.dot(h.astype(jnp.bfloat16), w2_ref[...].astype(jnp.bfloat16),
                preferred_element_type=jnp.float32) + b2_ref[...].astype(jnp.float32)
    o_ref[...] = (x + rf * y).astype(o_ref.dtype)               # fused scaled residual


def ffn_pallas(x, p, rf):
    """out = x + rf * FFN(LN(x));  fully fused, M-tiled."""
    M, D = x.shape
    ED = p["w1"].shape[1]
    TM = _row_tile(M)
    return pl.pallas_call(
        functools.partial(_ffn_kernel, rf=rf),
        out_shape=jax.ShapeDtypeStruct((M, D), x.dtype),
        grid=(pl.cdiv(M, TM),),
        in_specs=[pl.BlockSpec((TM, D), lambda i: (i, 0)),
                  _const_spec((1, D)), _const_spec((1, D)),
                  _const_spec((D, ED)), _const_spec((1, ED)),
                  _const_spec((ED, D)), _const_spec((1, D))],
        out_specs=pl.BlockSpec((TM, D), lambda i: (i, 0)),
        compiler_params=_cparams("parallel"),
    )(x, p["ln_g"], p["ln_b"], p["w1"], p["b1"], p["w2"], p["b2"])


def _ln_qkv_rope_kernel(x_ref, g_ref, lb_ref, w_ref, b_ref, cos_ref, sin_ref,
                        q_ref, k_ref, v_ref):
    x = x_ref[...].astype(jnp.float32)
    D = x.shape[-1]
    h = _layernorm(x, g_ref[...].astype(jnp.float32),
                   lb_ref[...].astype(jnp.float32)).astype(jnp.bfloat16)
    qkv = jnp.dot(h, w_ref[...].astype(jnp.bfloat16),
                  preferred_element_type=jnp.float32) + b_ref[...].astype(jnp.float32)
    q, k, v = qkv[:, :D], qkv[:, D:2 * D], qkv[:, 2 * D:]
    cos = cos_ref[...]
    sin = sin_ref[...]
    even = (jax.lax.broadcasted_iota(jnp.int32, q.shape, 1) % 2) == 0

    def rope(u):
        # Interleaved-pair RoPE: out[2i] = u[2i]*c_i - u[2i+1]*s_i ; out[2i+1] = u[2i+1]*c_i + u[2i]*s_i
        # Pairwise swap via two XLU lane-rolls + select; sin sign is pre-baked in the table.
        swapped = jnp.where(even,
                            pltpu.roll(u, shift=D - 1, axis=1),
                            pltpu.roll(u, shift=1, axis=1))
        return u * cos + swapped * sin

    q_ref[...] = rope(q).astype(q_ref.dtype)      # 1/sqrt(Dh) scale folded into Wq at init
    k_ref[...] = rope(k).astype(k_ref.dtype)
    v_ref[...] = v.astype(v_ref.dtype)


def ln_qkv_rope_pallas(x, p, cos_bt, sin_bt):
    """Fused LayerNorm + QKV projection + RoPE; three separate (M, D) bf16 outputs."""
    M, D = x.shape
    TM = _row_tile(M)
    row = pl.BlockSpec((TM, D), lambda i: (i, 0))
    out = jax.ShapeDtypeStruct((M, D), jnp.bfloat16)
    return pl.pallas_call(
        _ln_qkv_rope_kernel,
        out_shape=(out, out, out),
        grid=(pl.cdiv(M, TM),),
        in_specs=[row, _const_spec((1, D)), _const_spec((1, D)),
                  _const_spec((D, 3 * D)), _const_spec((1, 3 * D)), row, row],
        out_specs=(row, row, row),
        compiler_params=_cparams("parallel"),
    )(x, p["ln_g"], p["ln_b"], p["wqkv"], p["bqkv"], cos_bt, sin_bt)


def _flash_mha_kernel(q_ref, k_ref, v_ref, o_ref, m_sc, l_sc, acc_sc, *, n_heads):
    ki = pl.program_id(2)

    @pl.when(ki == 0)
    def _():
        m_sc[...] = jnp.full_like(m_sc[...], -jnp.inf)
        l_sc[...] = jnp.zeros_like(l_sc[...])
        acc_sc[...] = jnp.zeros_like(acc_sc[...])

    q = q_ref[0].astype(jnp.bfloat16)        # (TQ, D); softmax scale already folded into Wq
    k = k_ref[0].astype(jnp.bfloat16)        # (TK, D)
    v = v_ref[0].astype(jnp.bfloat16)
    Dh = q.shape[-1] // n_heads
    # TODO(synk): heads with Dh < 128 under-fill the MXU; batch heads via dot_general batch
    # dims (or pad head_dim) for production head sizes.
    for h in range(n_heads):
        sl = slice(h * Dh, (h + 1) * Dh)
        s = jax.lax.dot_general(q[:, sl], k[:, sl], (((1,), (1,)), ((), ())),
                                preferred_element_type=jnp.float32)      # (TQ, TK)
        m_prev = m_sc[:, h:h + 1]
        m_new = jnp.maximum(m_prev, jnp.max(s, axis=-1, keepdims=True))
        alpha = jnp.exp(m_prev - m_new)
        p = jnp.exp(s - m_new)
        l_sc[:, h:h + 1] = alpha * l_sc[:, h:h + 1] + jnp.sum(p, axis=-1, keepdims=True)
        acc_sc[:, sl] = alpha * acc_sc[:, sl] + jnp.dot(
            p.astype(jnp.bfloat16), v[:, sl], preferred_element_type=jnp.float32)
        m_sc[:, h:h + 1] = m_new

    @pl.when(ki == pl.num_programs(2) - 1)
    def _():
        for h in range(n_heads):
            sl = slice(h * Dh, (h + 1) * Dh)
            inv = pl.reciprocal(l_sc[:, h:h + 1], approx=True)   # EUP slot, not VALU
            o_ref[0, :, sl] = (acc_sc[:, sl] * inv).astype(o_ref.dtype)


def attention_pallas(q, k, v, n_heads):
    """q,k,v : (B, T, D) -> (B, T, D); flash-style KV tiling with online softmax."""
    B, T, D = q.shape
    TQ = _seq_tile(T)
    TK = _seq_tile(T)
    q_spec = pl.BlockSpec((1, TQ, D), lambda b, qi, ki: (b, qi, 0))
    kv_spec = pl.BlockSpec((1, TK, D), lambda b, qi, ki: (b, ki, 0))
    return pl.pallas_call(
        functools.partial(_flash_mha_kernel, n_heads=n_heads),
        out_shape=jax.ShapeDtypeStruct((B, T, D), q.dtype),
        grid=(B, T // TQ, T // TK),
        in_specs=[q_spec, kv_spec, kv_spec],
        out_specs=q_spec,
        scratch_shapes=[pltpu.VMEM((TQ, n_heads), jnp.float32),
                        pltpu.VMEM((TQ, n_heads), jnp.float32),
                        pltpu.VMEM((TQ, D), jnp.float32)],
        compiler_params=_cparams("parallel", "parallel", "arbitrary"),
    )(q, k, v)


def _conv_module_kernel(x_ref, g_ref, lb_ref, w1_ref, b1_ref, dw_ref, db_ref,
                        w2_ref, b2_ref, o_ref, *, ksize):
    x = x_ref[0].astype(jnp.float32)                            # (T, D)
    T = x.shape[0]
    h = _layernorm(x, g_ref[...].astype(jnp.float32), lb_ref[...].astype(jnp.float32))
    # pointwise conv 1 (D -> CE*D) + GLU
    y = jnp.dot(h.astype(jnp.bfloat16), w1_ref[...].astype(jnp.bfloat16),
                preferred_element_type=jnp.float32) + b1_ref[...].astype(jnp.float32)
    dglu = y.shape[-1] // 2
    h = y[:, :dglu] * jax.nn.sigmoid(y[:, dglu:])               # (T, D)
    # depthwise conv along time: XLU sublane rolls + iota edge masks ('same' zero padding);
    # eval-mode BatchNorm affine pre-folded into dw/db at parameter prep.
    pad = (ksize - 1) // 2
    t_idx = jax.lax.broadcasted_iota(jnp.int32, h.shape, 0)
    acc = jnp.zeros(h.shape, jnp.float32)
    for kk in range(ksize):
        off = kk - pad                                          # source row = t + off
        tap = h if off == 0 else pltpu.roll(h, shift=(-off) % T, axis=0)
        tap = tap * dw_ref[kk, :].astype(jnp.float32)
        if off != 0:
            valid = (t_idx + off >= 0) & (t_idx + off < T)
            tap = jnp.where(valid, tap, 0.0)
        acc = acc + tap
    h = acc + db_ref[...].astype(jnp.float32)
    h = h * jax.nn.sigmoid(h)                                   # Swish
    # pointwise conv 2 (D -> D)
    y = jnp.dot(h.astype(jnp.bfloat16), w2_ref[...].astype(jnp.bfloat16),
                preferred_element_type=jnp.float32) + b2_ref[...].astype(jnp.float32)
    o_ref[0] = (x + y).astype(o_ref.dtype)                      # fused residual


def conv_module_pallas(x, p, kernel_size):
    """Whole ConvolutionModule (+ residual) as one kernel per batch element."""
    B, T, D = x.shape
    D2 = p["pw1_w"].shape[1]
    # TODO(synk): tile the time axis with a (K-1) halo for long T / more grid depth on v7x.
    return pl.pallas_call(
        functools.partial(_conv_module_kernel, ksize=kernel_size),
        out_shape=jax.ShapeDtypeStruct((B, T, D), x.dtype),
        grid=(B,),
        in_specs=[pl.BlockSpec((1, T, D), lambda b: (b, 0, 0)),
                  _const_spec((1, D)), _const_spec((1, D)),
                  _const_spec((D, D2)), _const_spec((1, D2)),
                  _const_spec((kernel_size, D)), _const_spec((1, D)),
                  _const_spec((D, D)), _const_spec((1, D))],
        out_specs=pl.BlockSpec((1, T, D), lambda b: (b, 0, 0)),
        compiler_params=_cparams("parallel"),
    )(x, p["ln_g"], p["ln_b"], p["pw1_w"], p["pw1_b"], p["dw_w"], p["dw_b"],
      p["pw2_w"], p["pw2_b"])


def _proj_logsoftmax_kernel(x_ref, w_ref, b_ref, o_ref):
    x = x_ref[...].astype(jnp.bfloat16)
    y = jnp.dot(x, w_ref[...].astype(jnp.bfloat16),
                preferred_element_type=jnp.float32) + b_ref[...].astype(jnp.float32)
    z = y - jnp.max(y, axis=-1, keepdims=True)
    lse = jnp.log(jnp.sum(jnp.exp(z), axis=-1, keepdims=True))
    o_ref[...] = (z - lse).astype(o_ref.dtype)


def proj_logsoftmax_pallas(x, w, b):
    """Fused output projection + log_softmax, M-tiled."""
    # TODO(synk): class-axis tiling with an online-LSE pass for very large vocabularies (v7x 64 MiB VMEM).
    M, K = x.shape
    N = w.shape[1]
    TM = _row_tile(M)
    return pl.pallas_call(
        _proj_logsoftmax_kernel,
        out_shape=jax.ShapeDtypeStruct((M, N), jnp.float32),
        grid=(pl.cdiv(M, TM),),
        in_specs=[pl.BlockSpec((TM, K), lambda i: (i, 0)),
                  _const_spec((K, N)), _const_spec((1, N))],
        out_specs=pl.BlockSpec((TM, N), lambda i: (i, 0)),
        compiler_params=_cparams("parallel"),
    )(x, w, b)


# ----------------------------------------------------------------------------
# JAX glue: RoPE tables, NHWC im2col, module composition
# ----------------------------------------------------------------------------
def precompute_rope_tables(dim, seq_len):
    # TODO(synk): RoPE cos/sin table precompute stays in JAX glue (trace-time constant).
    theta = 1.0 / (10000.0 ** (jnp.arange(0, dim, 2, dtype=jnp.float32) / dim))
    freqs = jnp.outer(jnp.arange(seq_len, dtype=jnp.float32), theta)     # (T, dim/2)
    cos = jnp.cos(freqs)
    sin = jnp.sin(freqs)
    cos_e = jnp.repeat(cos, 2, axis=-1)                                  # [c0,c0,c1,c1,...]
    sin_e = jnp.stack([-sin, sin], axis=-1).reshape(seq_len, dim)        # [-s0,s0,-s1,s1,...]
    return cos_e, sin_e


def im2col_3x3_s2_nhwc(x):
    """x: (B, H, W, C) -> (B, Ho, Wo, 9*C) patches for a 3x3/stride-2 valid conv (NHWC)."""
    # TODO(synk): im2col patch extraction stays in JAX glue.
    B, H, W, C = x.shape
    Ho, Wo = (H - 3) // 2 + 1, (W - 3) // 2 + 1
    cols = []
    for ki in range(3):
        for kj in range(3):
            cols.append(x[:, ki:ki + 2 * Ho - 1:2, kj:kj + 2 * Wo - 1:2, :])
    p = jnp.stack(cols, axis=3)                            # (B, Ho, Wo, 9, C)
    return p.reshape(B, Ho, Wo, 9 * C)


def mha_module(x, p, cos_bt, sin_bt, n_heads):
    """Residual MHA: x + Wo(attn(RoPE(LN(x)Wq), RoPE(LN(x)Wk), LN(x)Wv))."""
    B, T, D = x.shape
    x2d = x.reshape(B * T, D)
    q, k, v = ln_qkv_rope_pallas(x2d, p, cos_bt, sin_bt)
    o = attention_pallas(q.reshape(B, T, D), k.reshape(B, T, D), v.reshape(B, T, D), n_heads)
    out = linear_pallas(o.reshape(B * T, D), p["wo"], p["bo"], residual=x2d)
    return out.reshape(B, T, D)                            # dropout = identity (eval)


def conformer_block(x, blk, cos_bt, sin_bt, cfg):
    B, T, D = x.shape
    rf = 0.5 if cfg["half_step_residual"] else 1.0
    x = ffn_pallas(x.reshape(B * T, D), blk["ffm1"], rf).reshape(B, T, D)   # residual fused
    x = mha_module(x, blk["mha"], cos_bt, sin_bt, cfg["n_heads"])           # residual fused
    x = conv_module_pallas(x, blk["conv"], cfg["kernel_size"])              # residual fused
    x = ffn_pallas(x.reshape(B * T, D), blk["ffm2"], rf).reshape(B, T, D)   # residual fused
    return x


def encoder_forward(x, input_lengths, p, cfg):
    B, T, F = x.shape
    D = cfg["model_dim"]
    # Conv2dSubsampling kept NHWC end-to-end (no NCHW relayouts between Pallas calls).
    x4 = x[:, :, :, None]                                  # (B, T, F, 1)
    pt1 = im2col_3x3_s2_nhwc(x4)                           # (B, T1, F1, 9)
    _, T1, F1, K1 = pt1.shape
    h = linear_pallas(pt1.reshape(-1, K1), p["conv1_w"], p["conv1_b"],
                      activation="relu", out_dtype=jnp.bfloat16)
    h = h.reshape(B, T1, F1, D)
    pt2 = im2col_3x3_s2_nhwc(h)                            # (B, T2, F2, 9*D)
    _, T2, F2, K2 = pt2.shape
    h = linear_pallas(pt2.reshape(-1, K2), p["conv2_w"], p["conv2_b"],
                      activation="relu", out_dtype=jnp.bfloat16)
    # NHWC flatten (freq-major, channel-minor); proj_w is laid out to match.
    h = h.reshape(B * T2, F2 * D)
    h = linear_pallas(h, p["proj_w"], p["proj_b"], out_dtype=jnp.bfloat16)  # + dropout identity
    out_lens = ((input_lengths - 1) // 2 - 1) // 2
    return h.reshape(B, T2, D), out_lens


def conformer_forward(x, input_lengths, params, cfg):
    x, out_lens = encoder_forward(x, input_lengths, params, cfg)
    B, T, D = x.shape
    cos_e, sin_e = precompute_rope_tables(D, T)
    cos_bt = jnp.tile(cos_e, (B, 1))                       # (B*T, D), rows = flattened (b, t)
    sin_bt = jnp.tile(sin_e, (B, 1))
    for blk in params["blocks"]:
        x = conformer_block(x, blk, cos_bt, sin_bt, cfg)
    logp = proj_logsoftmax_pallas(x.reshape(B * T, D), params["out_w"], params["out_b"])
    return logp.reshape(B, T, -1), out_lens


# ----------------------------------------------------------------------------
# Deterministic parameter init (shapes mirror the PyTorch module __init__;
# matmul weights stored bf16 for HBM/MXU efficiency, norm/bias params in f32).
# Folds applied at prep time: 1/sqrt(Dh) into Wq, eval-mode BatchNorm into depthwise conv.
# ----------------------------------------------------------------------------
def init_params(key, cfg):
    D = cfg["model_dim"]
    E = cfg["linear_expansion_factor"]
    CE = cfg["conv_expansion_factor"]
    K = cfg["kernel_size"]
    q_scale = 1.0 / math.sqrt(D // cfg["n_heads"])
    keys = iter(jax.random.split(key, 256))

    def w(shape, scale=0.02, dtype=jnp.bfloat16):
        return (scale * jax.random.normal(next(keys), shape)).astype(dtype)

    def zeros(shape):
        return jnp.zeros(shape, jnp.float32)

    def ones(shape):
        return jnp.ones(shape, jnp.float32)

    def ff_params():
        return {"ln_g": ones((1, D)), "ln_b": zeros((1, D)),
                "w1": w((D, E * D)), "b1": zeros((1, E * D)),
                "w2": w((E * D, D)), "b2": zeros((1, D))}

    def mha_params():
        wqkv = 0.02 * jax.random.normal(next(keys), (D, 3 * D))
        wqkv = wqkv.at[:, :D].multiply(q_scale)            # fold 1/sqrt(Dh) into Wq columns
        bqkv = zeros((1, 3 * D))                           # zero bias: scale is a no-op
        return {"ln_g": ones((1, D)), "ln_b": zeros((1, D)),
                "wqkv": wqkv.astype(jnp.bfloat16), "bqkv": bqkv,
                "wo": w((D, D)), "bo": zeros((1, D))}

    def conv_params():
        dw_w = w((K, D), dtype=jnp.float32)
        dw_b = zeros((1, D))
        bn_g, bn_b = ones((1, D)), zeros((1, D))
        # fold eval-mode BatchNorm1d (fresh running stats: mean=0, var=1) into depthwise w/b
        s = bn_g * jax.lax.rsqrt(jnp.float32(1.0 + 1e-5))
        return {"ln_g": ones((1, D)), "ln_b": zeros((1, D)),
                "pw1_w": w((D, CE * D)), "pw1_b": zeros((1, CE * D)),
                "dw_w": dw_w * s, "dw_b": dw_b * s + bn_b,
                "pw2_w": w((D, D)), "pw2_b": zeros((1, D))}

    F2 = ((cfg["input_dim"] - 1) // 2 - 1) // 2
    params = {
        "conv1_w": w((9, D)), "conv1_b": zeros((1, D)),          # (3*3*Cin, D) im2col weight
        "conv2_w": w((9 * D, D)), "conv2_b": zeros((1, D)),
        "proj_w": w((F2 * D, D)), "proj_b": zeros((1, D)),
        "blocks": [{"ffm1": ff_params(), "mha": mha_params(),
                    "conv": conv_params(), "ffm2": ff_params()}
                   for _ in range(cfg["num_conformer_blocks"])],
        "out_w": w((D, cfg["num_classes"])), "out_b": zeros((1, cfg["num_classes"])),
    }
    return params


# ----------------------------------------------------------------------------
if __name__ == "__main__":
    cfg = dict(input_dim=16, model_dim=128, num_classes=128, n_heads=2,
               linear_expansion_factor=4, conv_expansion_factor=2,
               half_step_residual=True, kernel_size=7, num_conformer_blocks=2)

    key = jax.random.PRNGKey(0)
    pkey, xkey = jax.random.split(key)
    params = init_params(pkey, cfg)

    B, T = 2, 70                                    # subsampled time = 16
    x = jax.random.normal(xkey, (B, T, cfg["input_dim"]), jnp.float32)
    input_lengths = jnp.array([70, 62], jnp.int32)

    logp, out_lens = conformer_forward(x, input_lengths, params, cfg)
    jax.block_until_ready((logp, out_lens))

    assert logp.shape == (B, 16, cfg["num_classes"])
    assert out_lens.shape == (B,)
    assert bool(jnp.all(jnp.isfinite(logp)))
    print("KERNEL_OK")
</pallas_src>

<mosaic_0001>
module attributes {stable_mosaic.version = 11 : i64} {
  func.func @k(%arg0: i32, %arg1: memref<8x128xf32, #tpu.memory_space<vmem>>, %arg2: memref<8x128xf32, #tpu.memory_space<vmem>>) attributes {dimension_semantics = [#tpu.dimension_semantics<arbitrary>], iteration_bounds = array<i64: 1>, scalar_prefetch = 0 : i64, scratch_operands = 0 : i64, tpu.core_type = #tpu.core_type<tc>, window_params = [{pipeline_mode = #tpu.pipeline_mode<synchronous>, transform_indices = @transform_0, window_bounds = array<i64: 8, 128>}, {pipeline_mode = #tpu.pipeline_mode<synchronous>, transform_indices = @transform_1, window_bounds = array<i64: 8, 128>}]} {
    %c0 = arith.constant 0 : index
    %c0_0 = arith.constant 0 : index
    %0 = vector.load %arg1[%c0, %c0_0] : memref<8x128xf32, #tpu.memory_space<vmem>>, vector<8x128xf32>
    %c0_1 = arith.constant 0 : index
    %c0_2 = arith.constant 0 : index
    %1 = vector.load %arg2[%c0_1, %c0_2] : memref<8x128xf32, #tpu.memory_space<vmem>>, vector<8x128xf32>
    tpu.vector_store %arg2[%c0_1, %c0_2], %0 {strides = array<i32>} : memref<8x128xf32, #tpu.memory_space<vmem>>, vector<8x128xf32>,
    return
  }
  func.func @transform_0(%arg0: i32) -> (i32, i32) {
    %c0_i32 = arith.constant 0 : i32
    %c0_i32_0 = arith.constant 0 : i32
    %c0_i32_1 = arith.constant 0 : i32
    return %c0_i32, %c0_i32_0 : i32, i32
  }
  func.func @transform_1(%arg0: i32) -> (i32, i32) {
    %c0_i32 = arith.constant 0 : i32
    %c0_i32_0 = arith.constant 0 : i32
    %c0_i32_1 = arith.constant 0 : i32
    return %c0_i32, %c0_i32_0 : i32, i32
  }
}

module attributes {stable_mosaic.version = 11 : i64} {
  func.func @_linear_kernel(%arg0: i32, %arg1: memref<476x9xf32, #tpu.memory_space<vmem>>, %arg2: memref<9x128xbf16, #tpu.memory_space<vmem>>, %arg3: memref<1x128xf32, #tpu.memory_space<vmem>>, %arg4: memref<476x128xbf16, #tpu.memory_space<vmem>>) attributes {dimension_semantics = [#tpu.dimension_semantics<parallel>], iteration_bounds = array<i64: 1>, scalar_prefetch = 0 : i64, scratch_operands = 0 : i64, tpu.core_type = #tpu.core_type<tc>, window_params = [{transform_indices = @transform_0, window_bounds = array<i64: 476, 9>}, {pipeline_mode = #tpu.pipeline_mode<synchronous>, transform_indices = @transform_1, window_bounds = array<i64: 9, 128>}, {pipeline_mode = #tpu.pipeline_mode<synchronous>, transform_indices = @transform_2, window_bounds = array<i64: 1, 128>}, {transform_indices = @transform_3, window_bounds = array<i64: 476, 128>}]} {
    %c0 = arith.constant 0 : index
    %c0_0 = arith.constant 0 : index
    %0 = vector.load %arg1[%c0, %c0_0] : memref<476x9xf32, #tpu.memory_space<vmem>>, vector<476x9xf32>
    %1 = arith.truncf %0 : vector<476x9xf32> to vector<476x9xbf16>
    %c0_1 = arith.constant 0 : index
    %c0_2 = arith.constant 0 : index
    %2 = vector.load %arg2[%c0_1, %c0_2] : memref<9x128xbf16, #tpu.memory_space<vmem>>, vector<9x128xbf16>
    %cst = arith.constant dense<0.000000e+00> : vector<476x128xf32>
    %3 = tpu.matmul %1, %2, %cst {dimension_numbers = #tpu.dot_dimension_numbers<[1], [0], [0], [1], [0, 0, 1, 1], [], []>} : vector<476x9xbf16>, vector<9x128xbf16>, vector<476x128xf32> -> vector<476x128xf32>
    %c0_3 = arith.constant 0 : index
    %c0_4 = arith.constant 0 : index
    %4 = vector.load %arg3[%c0_3, %c0_4] : memref<1x128xf32, #tpu.memory_space<vmem>>, vector<1x128xf32>
    %5 = vector.broadcast %4 : vector<1x128xf32> to vector<476x128xf32>
    %6 = arith.addf %3, %5 : vector<476x128xf32>
    %cst_5 = arith.constant 0.000000e+00 : f32
    %7 = vector.broadcast %cst_5 : f32 to vector<476x128xf32>
    %8 = arith.maximumf %6, %7 : vector<476x128xf32>
    %9 = arith.truncf %8 : vector<476x128xf32> to vector<476x128xbf16>
    %c0_6 = arith.constant 0 : index
    %c0_7 = arith.constant 0 : index
    %10 = vector.load %arg4[%c0_6, %c0_7] : memref<476x128xbf16, #tpu.memory_space<vmem>>, vector<476x128xbf16>
    tpu.vector_store %arg4[%c0_6, %c0_7], %9 {strides = array<i32>} : memref<476x128xbf16, #tpu.memory_space<vmem>>, vector<476x128xbf16>,
    return
  }
  func.func @transform_0(%arg0: i32) -> (i32, i32) {
    %c0_i32 = arith.constant 0 : i32
    %c0_i32_0 = arith.constant 0 : i32
    return %arg0, %c0_i32 : i32, i32
  }
  func.func @transform_1(%arg0: i32) -> (i32, i32) {
    %c0_i32 = arith.constant 0 : i32
    %c0_i32_0 = arith.constant 0 : i32
    %c0_i32_1 = arith.constant 0 : i32
    return %c0_i32, %c0_i32_0 : i32, i32
  }
  func.func @transform_2(%arg0: i32) -> (i32, i32) {
    %c0_i32 = arith.constant 0 : i32
    %c0_i32_0 = arith.constant 0 : i32
    %c0_i32_1 = arith.constant 0 : i32
    return %c0_i32, %c0_i32_0 : i32, i32
  }
  func.func @transform_3(%arg0: i32) -> (i32, i32) {
    %c0_i32 = arith.constant 0 : i32
    %c0_i32_0 = arith.constant 0 : i32
    return %arg0, %c0_i32 : i32, i32
  }
}

</mosaic_0001>

<bundles_post_ra>
// kernel: tpu_custom_call.1
= control target key start
LH: loop header
LB: loop body
LE: loop exit
PB: predicated region body
PF: predicated region fallthrough
CT: control target
= control target key end

     0   :  { %6 = vsyncpa [#allocation3], 0  ;;  %s124_s0 = inlined_call_operand.hbm [shape: f32[8,128], index: 0, kind: input, shape index: {}]   ;;  %s125_s1 = inlined_call_operand.hbm [shape: f32[8,128], index: 1, kind: output, shape index: {}]  }
   0x1   :  { %7 = vsyncpa [#allocation4], 0  ;;  %s88_s6 = smov [#allocation2]   ;;  %s40_s10 = scalar_lea.hbm %s124_s0, 128 }
   0x2   :  { %s14_s7 = sshll.u32 %s88_s6, 4  ;;  %p41_p0 = scmp.ne.s32.totalorder %s124_s0, %s40_s10  ;;  %s15_s7 = int_to_ptr.vmem [resolvable:$true] %s14_s7 }
   0x3   :  { %p44_p1 = scmp.lt.u32.totalorder %s40_s10, %s124_s0 }
   0x5   :  { %p46_p2 = pnand %p44_p1, %p41_p0 }
   0x7   :  { %49 = shalt.err (!%p46_p2)
}
   0x8   :  { %s50_s15 = scalar_lea.vmem %s15_s7, 128  ;;  %p55_p4 = scmp.lt.s32.totalorder %s15_s7, %s15_s7 }
   0x9   :  { %p51_p3 = scmp.ne.s32.totalorder %s15_s7, %s50_s15  ;;  %p56_p5 = scmp.lt.s32.totalorder %s50_s15, %s50_s15 }
   0xb   :  { %p57_p6 = por %p56_p5, %p55_p4 }
   0xd   :  { %p58_p7 = pnand %p57_p6, %p51_p3 }
   0xf   :  { %61 = shalt.err (!%p58_p7)
}
  0x10   :  { %17 = dma.hbm_to_vmem [thread:$0]  %s124_s0, 128, %s15_s7, [#allocation3]  }
  0x11   :  { %84 = dma.done.wait [#allocation3], 128  }
  0x12   :  { %85 = vsyncadd [#allocation3], 4294967168  ;;  %s89_s18 = smov [#allocation5]   ;;  %v21_v0 = vld [vmem:[#allocation2] sm:$0xff] }
  0x13   :  { %s29_s19 = sshll.u32 %s89_s18, 4  ;;  %22 = vst [vmem:[#allocation5] sm:$0xff] %v21_v0  ;;  %s30_s19 = int_to_ptr.vmem [resolvable:$true] %s29_s19 }
  0x14   :  { %s62_s20 = scalar_lea.vmem %s30_s19, 128  ;;  %p67_p9 = scmp.lt.s32.totalorder %s30_s19, %s30_s19 }
  0x15   :  { %p63_p8 = scmp.ne.s32.totalorder %s30_s19, %s62_s20  ;;  %p68_p10 = scmp.lt.s32.totalorder %s62_s20, %s62_s20 }
  0x17   :  { %p69_p11 = por %p68_p10, %p67_p9 }
  0x19   :  { %p70_p12 = pnand %p69_p11, %p63_p8 }
  0x1b   :  { %73 = shalt.err (!%p70_p12)
}
  0x1c   :  { %s74_s23 = scalar_lea.hbm %s125_s1, 128 }
  0x1d   :  { %p75_p13 = scmp.ne.s32.totalorder %s125_s1, %s74_s23  ;;  %p78_p0 = scmp.lt.u32.totalorder %s74_s23, %s125_s1 }
  0x1f   :  { %p80_p1 = pnand %p78_p0, %p75_p13 }
  0x21   :  { %83 = shalt.err (!%p80_p1)
}
  0x22   :  { %32 = dma.vmem_to_hbm [thread:$0]  %s30_s19, 128, %s125_s1, [#allocation4]  }
  0x23   :  { %86 = dma.done.wait [#allocation4], 128  }
  0x24   :  { %87 = vsyncadd [#allocation4], 4294967168 }
  0x25   :  { %36 = vsyncpa [#allocation3], 1 }
  0x26   :  { %37 = vsyncpa [#allocation4], 1 }

// kernel: tpu_custom_call.1
= control target key start
LH: loop header
LB: loop body
LE: loop exit
PB: predicated region body
PF: predicated region fallthrough
CT: control target
= control target key end

     0   :  { %vm211_vm0 = vcmask 1043456   ;;  %vm212_vm1 = vcmask 1044480   ;;  %vm120_vm2 = vcmask 72704   ;;  %v1316_v3 = vmov 65535   ;;  %s1630_s0 = inlined_call_operand.vmem [shape: f32[476,9], index: 0, kind: input, shape index: {}]   ;;  %s1631_s1 = inlined_call_operand.vmem [shape: bf16[9,128], index: 1, kind: input, shape index: {}]   ;;  %s1632_s2 = inlined_call_operand.vmem [shape: f32[1,128], index: 2, kind: input, shape index: {}]   ;;  %s1633_s3 = inlined_call_operand.hbm [shape: bf16[476,128], index: 3, kind: output, shape index: {}]  }
   0x1   :  { %v1291_v0 = vld [vmem:[%s1631_s1] sm:$0x1f]   ;;  %v17_v2 = vld [vmem:[%s1630_s0 + $0x8] sm:$0xff]  ;;  %v213_v4 = vsel %vm211_vm0, 4294967295, %v1316_v3  ;;  %v18_v6 = vld [vmem:[%s1630_s0 + $0x10] sm:$0xff] }
   0x2   :  { %v16_v1 = vld [vmem:[%s1630_s0] sm:$0xff]  ;;  %v19_v7 = vld [vmem:[%s1630_s0 + $0x18] sm:$0xff]  ;;  %v214_v9 = vsel %vm212_vm1, %v213_v4, 0  ;;  %v49_v10 = vld [vmem:[%s1630_s0 + $0x108] sm:$0xff] }
   0x3   :  { %v76_v5 = vpack.c.bf16 %v17_v2, %v16_v1  ;;  %v48_v8 = vld [vmem:[%s1630_s0 + $0x100] sm:$0xff]  ;;  %v50_v11 = vld [vmem:[%s1630_s0 + $0x110] sm:$0xff]  ;;  %v51_v12 = vld [vmem:[%s1630_s0 + $0x118] sm:$0xff]  ;;  %v216_v13 = vand.u32 %v1291_v0, %v214_v9  ;;  %v77_v19 = vpack.c.bf16 %v19_v7, %v18_v6 }
   0x4   :  { %v92_v14 = vpack.c.bf16 %v49_v10, %v48_v8  ;;  %v20_v15 = vld [vmem:[%s1630_s0 + $0x20] sm:$0xff]  ;;  %v21_v16 = vld [vmem:[%s1630_s0 + $0x28] sm:$0xff]  ;;  %v93_v20 = vpack.c.bf16 %v51_v12, %v50_v11  ;;  %v22_v23 = vld [vmem:[%s1630_s0 + $0x30] sm:$0xff] }
   0x5   :  { %1225 = vmatprep.mubr.msk.bf16.mxu0 %vm120_vm2, %v76_v5  ;;  %v52_v17 = vld [vmem:[%s1630_s0 + $0x120] sm:$0xff]  ;;  %v53_v18 = vld [vmem:[%s1630_s0 + $0x128] sm:$0xff]  ;;  %1223 = vmatprep.subr.bf16.mxu0 %v216_v13  ;;  %v78_v21 = vpack.c.bf16 %v21_v16, %v20_v15  ;;  %v23_v24 = vld [vmem:[%s1630_s0 + $0x38] sm:$0xff] }
   0x6   :  { %1285 = vmatprep.subr.bf16.mxu1 %v216_v13  ;;  %1224 = vmatpush3.bf16.msra.mxu0 %v216_v13  ;;  %v94_v22 = vpack.c.bf16 %v53_v18, %v52_v17  ;;  %v54_v25 = vld [vmem:[%s1630_s0 + $0x130] sm:$0xff]  ;;  %v55_v26 = vld [vmem:[%s1630_s0 + $0x138] sm:$0xff]  ;;  %v24_v27 = vld [vmem:[%s1630_s0 + $0x40] sm:$0xff]  ;;  %v79_v31 = vpack.c.bf16 %v23_v24, %v22_v23 }
   0x7   :  { %1286 = vmatpush3.bf16.msra.mxu1 %v216_v13  ;;  %1257 = vmatprep.mubr.msk.bf16.mxu1 %vm120_vm2, %v92_v14  ;;  %v25_v28 = vld [vmem:[%s1630_s0 + $0x48] sm:$0xff]  ;;  %v56_v29 = vld [vmem:[%s1630_s0 + $0x140] sm:$0xff]  ;;  %v95_v32 = vpack.c.bf16 %v55_v26, %v54_v25  ;;  %v26_v35 = vld [vmem:[%s1630_s0 + $0x50] sm:$0xff] }
   0x8   :  { %v57_v30 = vld [vmem:[%s1630_s0 + $0x148] sm:$0xff]  ;;  %v80_v33 = vpack.c.bf16 %v25_v28, %v24_v27  ;;  %v27_v36 = vld [vmem:[%s1630_s0 + $0x58] sm:$0xff]  ;;  %v58_v37 = vld [vmem:[%s1630_s0 + $0x150] sm:$0xff] }
   0x9   :  { %1226 = vmatmul.mubr.msk.bf16.vlgmr.msra.gmra.mrb[0].mxu0 %vm120_vm2, %v77_v19  ;;  %v96_v34 = vpack.c.bf16 %v57_v30, %v56_v29  ;;  %v59_v38 = vld [vmem:[%s1630_s0 + $0x158] sm:$0xff]  ;;  %v28_v39 = vld [vmem:[%s1630_s0 + $0x60] sm:$0xff]  ;;  %v29_v40 = vld [vmem:[%s1630_s0 + $0x68] sm:$0xff] }
   0xa   :  { %1258 = vmatmul.mubr.msk.bf16.vlgmr.msra.gmra.mrb[0].mxu1 %vm120_vm2, %v93_v20  ;;  %1229 = vmatprep.mubr.msk.bf16.mxu0 %vm120_vm2, %v78_v21  ;;  %v60_v41 = vld [vmem:[%s1630_s0 + $0x160] sm:$0xff]  ;;  %v61_v42 = vld [vmem:[%s1630_s0 + $0x168] sm:$0xff] }
   0xb   :  { %1261 = vmatprep.mubr.msk.bf16.mxu1 %vm120_vm2, %v94_v22 }
  0x11   :  { %1230 = vmatmul.mubr.msk.bf16.gmra.mrb[4].mxu0 %vm120_vm2, %v79_v31 }
  0x12   :  { %1262 = vmatmul.mubr.msk.bf16.gmra.mrb[4].mxu1 %vm120_vm2, %v95_v32  ;;  %1233 = vmatprep.mubr.msk.bf16.mxu0 %vm120_vm2, %v80_v33 }
  0x13   :  { %1265 = vmatprep.mubr.msk.bf16.mxu1 %vm120_vm2, %v96_v34 }
  0x14   :  { %8 = vsyncpa [#allocation3], 0  ;;  %v81_v43 = vpack.c.bf16 %v27_v36, %v26_v35  ;;  %v97_v44 = vpack.c.bf16 %v59_v38, %v58_v37  ;;  %v82_v45 = vpack.c.bf16 %v29_v40, %v28_v39  ;;  %v98_v46 = vpack.c.bf16 %v61_v42, %v60_v41  ;;  %v30_v47 = vld [vmem:[%s1630_s0 + $0x70] sm:$0xff]  ;;  %v31_v48 = vld [vmem:[%s1630_s0 + $0x78] sm:$0xff] }
  0x15   :  { %v62_v49 = vld [vmem:[%s1630_s0 + $0x170] sm:$0xff]  ;;  %v63_v50 = vld [vmem:[%s1630_s0 + $0x178] sm:$0xff]  ;;  %v32_v51 = vld [vmem:[%s1630_s0 + $0x80] sm:$0xff]  ;;  %v83_v55 = vpack.c.bf16 %v31_v48, %v30_v47 }
  0x16   :  { %v33_v52 = vld [vmem:[%s1630_s0 + $0x88] sm:$0xff]  ;;  %v64_v53 = vld [vmem:[%s1630_s0 + $0x180] sm:$0xff]  ;;  %v99_v56 = vpack.c.bf16 %v63_v50, %v62_v49  ;;  %v34_v59 = vld [vmem:[%s1630_s0 + $0x90] sm:$0xff] }
  0x17   :  { %v65_v54 = vld [vmem:[%s1630_s0 + $0x188] sm:$0xff]  ;;  %v84_v57 = vpack.c.bf16 %v33_v52, %v32_v51  ;;  %v35_v60 = vld [vmem:[%s1630_s0 + $0x98] sm:$0xff]  ;;  %v66_v61 = vld [vmem:[%s1630_s0 + $0x190] sm:$0xff] }
  0x18   :  { %v100_v58 = vpack.c.bf16 %v65_v54, %v64_v53  ;;  %v67_v62 = vld [vmem:[%s1630_s0 + $0x198] sm:$0xff]  ;;  %v36_v63 = vld [vmem:[%s1630_s0 + $0xa0] sm:$0xff]  ;;  %v37_v0 = vld [vmem:[%s1630_s0 + $0xa8] sm:$0xff]  ;;  %v85_v3 = vpack.c.bf16 %v35_v60, %v34_v59 }
  0x19   :  { %1234 = vmatmul.mubr.msk.bf16.gmra.mrb[8].mxu0 %vm120_vm2, %v81_v43  ;;  %v68_v1 = vld [vmem:[%s1630_s0 + $0x1a0] sm:$0xff]  ;;  %v69_v2 = vld [vmem:[%s1630_s0 + $0x1a8] sm:$0xff]  ;;  %v101_v4 = vpack.c.bf16 %v67_v62, %v66_v61  ;;  %v86_v5 = vpack.c.bf16 %v37_v0, %v36_v63  ;;  %v38_v7 = vld [vmem:[%s1630_s0 + $0xb0] sm:$0xff] }
  0x1a   :  { %1266 = vmatmul.mubr.msk.bf16.gmra.mrb[8].mxu1 %vm120_vm2, %v97_v44  ;;  %1237 = vmatprep.mubr.msk.bf16.mxu0 %vm120_vm2, %v82_v45  ;;  %v102_v6 = vpack.c.bf16 %v69_v2, %v68_v1  ;;  %v39_v8 = vld [vmem:[%s1630_s0 + $0xb8] sm:$0xff]  ;;  %v70_v9 = vld [vmem:[%s1630_s0 + $0x1b0] sm:$0xff]  ;;  %v40_v11 = vld [vmem:[%s1630_s0 + $0xc0] sm:$0xff] }
  0x1b   :  { %1269 = vmatprep.mubr.msk.bf16.mxu1 %vm120_vm2, %v98_v46  ;;  %v71_v10 = vld [vmem:[%s1630_s0 + $0x1b8] sm:$0xff]  ;;  %v41_v12 = vld [vmem:[%s1630_s0 + $0xc8] sm:$0xff]  ;;  %v72_v13 = vld [vmem:[%s1630_s0 + $0x1c0] sm:$0xff]  ;;  %v87_v15 = vpack.c.bf16 %v39_v8, %v38_v7 }
  0x1c   :  { %v73_v14 = vld [vmem:[%s1630_s0 + $0x1c8] sm:$0xff]  ;;  %v103_v16 = vpack.c.bf16 %v71_v10, %v70_v9  ;;  %v88_v17 = vpack.c.bf16 %v41_v12, %v40_v11  ;;  %v42_v19 = vld [vmem:[%s1630_s0 + $0xd0] sm:$0xff]  ;;  %v43_v20 = vld [vmem:[%s1630_s0 + $0xd8] sm:$0xff] }
  0x1d   :  { %v104_v18 = vpack.c.bf16 %v73_v14, %v72_v13  ;;  %v74_v21 = vld [vmem:[%s1630_s0 + $0x1d0] sm:$0xff]  ;;  %v75_v22 = vld [vmem:[%s1630_s0 + $0x1d8] sm:$0xf]  ;;  %v44_v23 = vld [vmem:[%s1630_s0 + $0xe0] sm:$0xff]  ;;  %v89_v25 = vpack.c.bf16 %v43_v20, %v42_v19 }
  0x1e   :  { %v45_v24 = vld [vmem:[%s1630_s0 + $0xe8] sm:$0xff]  ;;  %v105_v26 = vpack.c.bf16 %v75_v22, %v74_v21  ;;  %v46_v28 = vld [vmem:[%s1630_s0 + $0xf0] sm:$0xff]  ;;  %v47_v29 = vld [vmem:[%s1630_s0 + $0xf8] sm:$0xff]  ;;  %s1317_s0 = smov [#allocation2]  }
  0x1f   :  { %v90_v27 = vpack.c.bf16 %v45_v24, %v44_v23  ;;  %v91_v30 = vpack.c.bf16 %v47_v29, %v46_v28  ;;  %v1556_v31 = vld [vmem:[%s1632_s2] ss:$0 sm:$0xff]  ;;  %s856_s2 = sshll.u32 %s1317_s0, 4  ;;  %s857_s2 = int_to_ptr.vmem [resolvable:$true] %s856_s2 }
  0x20   :  { %s1292_s23 = scalar_lea.vmem %s857_s2, 3840  ;;  %p1297_p1 = scmp.lt.s32.totalorder %s857_s2, %s857_s2 }
  0x21   :  { %1238 = vmatmul.mubr.msk.bf16.gmra.mrb[12].mxu0 %vm120_vm2, %v83_v55  ;;  %p1293_p0 = scmp.ne.s32.totalorder %s857_s2, %s1292_s23  ;;  %p1298_p2 = scmp.lt.s32.totalorder %s1292_s23, %s1292_s23 }
  0x22   :  { %1270 = vmatmul.mubr.msk.bf16.gmra.mrb[12].mxu1 %vm120_vm2, %v99_v56  ;;  %1241 = vmatprep.mubr.msk.bf16.mxu0 %vm120_vm2, %v84_v57 }
  0x23   :  { %1273 = vmatprep.mubr.msk.bf16.mxu1 %vm120_vm2, %v100_v58  ;;  %p1299_p3 = por %p1298_p2, %p1297_p1 }
  0x25   :  { %p1300_p4 = pnand %p1299_p3, %p1293_p0 }
  0x29   :  { %1242 = vmatmul.mubr.msk.bf16.gmra.mrb[16].mxu0 %vm120_vm2, %v85_v3 }
  0x2a   :  { %1274 = vmatmul.mubr.msk.bf16.gmra.mrb[16].mxu1 %vm120_vm2, %v101_v4  ;;  %1245 = vmatprep.mubr.msk.bf16.mxu0 %vm120_vm2, %v86_v5 }
  0x2b   :  { %1277 = vmatprep.mubr.msk.bf16.mxu1 %vm120_vm2, %v102_v6 }
  0x31   :  { %1246 = vmatmul.mubr.msk.bf16.gmra.mrb[20].mxu0 %vm120_vm2, %v87_v15 }
  0x32   :  { %1278 = vmatmul.mubr.msk.bf16.gmra.mrb[20].mxu1 %vm120_vm2, %v103_v16  ;;  %1249 = vmatprep.mubr.msk.bf16.mxu0 %vm120_vm2, %v88_v17 }
  0x33   :  { %1281 = vmatprep.mubr.msk.bf16.mxu1 %vm120_vm2, %v104_v18 }
  0x39   :  { %1250 = vmatmul.mubr.msk.bf16.gmra.mrb[24].mxu0 %vm120_vm2, %v89_v25 }
  0x3a   :  { %1282 = vmatmul.mubr.msk.bf16.gmra.mrb[24].mxu1 %vm120_vm2, %v105_v26  ;;  %1253 = vmatprep.mubr.msk.bf16.mxu0 %vm120_vm2, %v90_v27 }
  0x41   :  { %1254 = vmatmul.mubr.msk.bf16.gmra.mrb[28].mxu0 %vm120_vm2, %v91_v30 }
  0xdc   :  { %v1227_v32 = vpop.f32.mrb[0].mxu0 }
  0xdd   :  { %v1259_v33 = vpop.f32.mrb[0].mxu1  ;;  %v261_v34 = vadd.f32 %v1227_v32, %v1556_v31  ;;  %v252_v35 = vpop.f32.mrb[1].mxu0 }
  0xde   :  { %v389_v36 = vadd.f32 %v1259_v33, %v1556_v31  ;;  %v380_v37 = vpop.f32.mrb[1].mxu1  ;;  %v253_v38 = vadd.f32 %v1556_v31, %v252_v35  ;;  %v1228_v39 = vpop.f32.mrb[2].mxu0 }
  0xdf   :  { %v381_v40 = vadd.f32 %v1556_v31, %v380_v37  ;;  %v1260_v41 = vpop.f32.mrb[2].mxu1  ;;  %v264_v42 = vadd.f32 %v1228_v39, %v1556_v31  ;;  %v255_v43 = vpop.f32.mrb[3].mxu0  ;;  %v493_v50 = vmax.f32 %v261_v34, 0.0 }
  0xe0   :  { %v525_v44 = vmax.f32 %v389_v36, 0.0  ;;  %v392_v45 = vadd.f32 %v1260_v41, %v1556_v31  ;;  %v383_v46 = vpop.f32.mrb[3].mxu1  ;;  %v256_v47 = vadd.f32 %v1556_v31, %v255_v43  ;;  %v491_v53 = vmax.f32 %v253_v38, 0.0 }
  0xe1   :  { %v523_v48 = vmax.f32 %v381_v40, 0.0  ;;  %v384_v49 = vadd.f32 %v1556_v31, %v383_v46  ;;  %v494_v51 = vmax.f32 %v264_v42, 0.0 }
  0xe2   :  { %v526_v52 = vmax.f32 %v392_v45, 0.0  ;;  %v492_v54 = vmax.f32 %v256_v47, 0.0 }
  0xe3   :  { %v524_v55 = vmax.f32 %v384_v49, 0.0  ;;  %v1027_v56 = vpack.c.bf16 %v494_v51, %v493_v50 }
  0xe4   :  { %v1107_v57 = vpack.c.bf16 %v526_v52, %v525_v44  ;;  %v1022_v58 = vpack.c.bf16 %v492_v54, %v491_v53  ;;  %v1231_v59 = vpop.f32.mrb[4].mxu0 }
  0xe5   :  { %v1102_v60 = vpack.c.bf16 %v524_v55, %v523_v48  ;;  %v1263_v61 = vpop.f32.mrb[4].mxu1  ;;  %1164 = vst [vmem:[#allocation2 + $0x8] sm:$0xff] %v1027_v56   ;;  %v277_v62 = vadd.f32 %v1231_v59, %v1556_v31  ;;  %v268_v63 = vpop.f32.mrb[5].mxu0 }
  0xe6   :  { %1180 = vst [vmem:[#allocation2 + $0x88] sm:$0xff] %v1107_v57   ;;  %v405_v0 = vadd.f32 %v1263_v61, %v1556_v31  ;;  %v396_v1 = vpop.f32.mrb[5].mxu1  ;;  %1023 = vst [vmem:[#allocation2] sm:$0xff] %v1022_v58   ;;  %v269_v2 = vadd.f32 %v1556_v31, %v268_v63  ;;  %v1232_v3 = vpop.f32.mrb[6].mxu0 }
  0xe7   :  { %1179 = vst [vmem:[#allocation2 + $0x80] sm:$0xff] %v1102_v60   ;;  %v397_v4 = vadd.f32 %v1556_v31, %v396_v1  ;;  %v1264_v5 = vpop.f32.mrb[6].mxu1  ;;  %v280_v6 = vadd.f32 %v1232_v3, %v1556_v31  ;;  %v271_v7 = vpop.f32.mrb[7].mxu0  ;;  %v497_v14 = vmax.f32 %v277_v62, 0.0 }
  0xe8   :  { %v529_v8 = vmax.f32 %v405_v0, 0.0  ;;  %v408_v9 = vadd.f32 %v1264_v5, %v1556_v31  ;;  %v399_v10 = vpop.f32.mrb[7].mxu1  ;;  %v272_v11 = vadd.f32 %v1556_v31, %v271_v7  ;;  %v495_v17 = vmax.f32 %v269_v2, 0.0 }
  0xe9   :  { %v527_v12 = vmax.f32 %v397_v4, 0.0  ;;  %v400_v13 = vadd.f32 %v1556_v31, %v399_v10  ;;  %v498_v15 = vmax.f32 %v280_v6, 0.0 }
  0xea   :  { %v530_v16 = vmax.f32 %v408_v9, 0.0  ;;  %v496_v18 = vmax.f32 %v272_v11, 0.0 }
  0xeb   :  { %v528_v19 = vmax.f32 %v400_v13, 0.0  ;;  %v1037_v20 = vpack.c.bf16 %v498_v15, %v497_v14 }
  0xec   :  { %v1117_v21 = vpack.c.bf16 %v530_v16, %v529_v8  ;;  %v1032_v22 = vpack.c.bf16 %v496_v18, %v495_v17  ;;  %v1235_v23 = vpop.f32.mrb[8].mxu0 }
  0xed   :  { %v1112_v24 = vpack.c.bf16 %v528_v19, %v527_v12  ;;  %v1267_v25 = vpop.f32.mrb[8].mxu1  ;;  %1166 = vst [vmem:[#allocation2 + $0x18] sm:$0xff] %v1037_v20   ;;  %v293_v26 = vadd.f32 %v1235_v23, %v1556_v31  ;;  %v284_v27 = vpop.f32.mrb[9].mxu0 }
  0xee   :  { %1182 = vst [vmem:[#allocation2 + $0x98] sm:$0xff] %v1117_v21   ;;  %v421_v28 = vadd.f32 %v1267_v25, %v1556_v31  ;;  %v412_v29 = vpop.f32.mrb[9].mxu1  ;;  %1165 = vst [vmem:[#allocation2 + $0x10] sm:$0xff] %v1032_v22   ;;  %v285_v30 = vadd.f32 %v1556_v31, %v284_v27  ;;  %v1236_v32 = vpop.f32.mrb[10].mxu0 }
  0xef   :  { %1181 = vst [vmem:[#allocation2 + $0x90] sm:$0xff] %v1112_v24   ;;  %v413_v33 = vadd.f32 %v1556_v31, %v412_v29  ;;  %v1268_v34 = vpop.f32.mrb[10].mxu1  ;;  %v296_v35 = vadd.f32 %v1236_v32, %v1556_v31  ;;  %v287_v36 = vpop.f32.mrb[11].mxu0  ;;  %v501_v43 = vmax.f32 %v293_v26, 0.0 }
  0xf0   :  { %v533_v37 = vmax.f32 %v421_v28, 0.0  ;;  %v424_v38 = vadd.f32 %v1268_v34, %v1556_v31  ;;  %v415_v39 = vpop.f32.mrb[11].mxu1  ;;  %v288_v40 = vadd.f32 %v1556_v31, %v287_v36  ;;  %v499_v46 = vmax.f32 %v285_v30, 0.0 }
  0xf1   :  { %v531_v41 = vmax.f32 %v413_v33, 0.0  ;;  %v416_v42 = vadd.f32 %v1556_v31, %v415_v39  ;;  %v502_v44 = vmax.f32 %v296_v35, 0.0 }
  0xf2   :  { %v534_v45 = vmax.f32 %v424_v38, 0.0  ;;  %v500_v47 = vmax.f32 %v288_v40, 0.0 }
  0xf3   :  { %v532_v48 = vmax.f32 %v416_v42, 0.0  ;;  %v1047_v49 = vpack.c.bf16 %v502_v44, %v501_v43 }
  0xf4   :  { %v1127_v50 = vpack.c.bf16 %v534_v45, %v533_v37  ;;  %v1042_v51 = vpack.c.bf16 %v500_v47, %v499_v46  ;;  %v1239_v52 = vpop.f32.mrb[12].mxu0 }
  0xf5   :  { %v1122_v53 = vpack.c.bf16 %v532_v48, %v531_v41  ;;  %v1271_v54 = vpop.f32.mrb[12].mxu1  ;;  %1168 = vst [vmem:[#allocation2 + $0x28] sm:$0xff] %v1047_v49   ;;  %v309_v55 = vadd.f32 %v1239_v52, %v1556_v31  ;;  %v300_v56 = vpop.f32.mrb[13].mxu0 }
  0xf6   :  { %1184 = vst [vmem:[#allocation2 + $0xa8] sm:$0xff] %v1127_v50   ;;  %v437_v57 = vadd.f32 %v1271_v54, %v1556_v31  ;;  %v428_v58 = vpop.f32.mrb[13].mxu1  ;;  %1167 = vst [vmem:[#allocation2 + $0x20] sm:$0xff] %v1042_v51   ;;  %v301_v59 = vadd.f32 %v1556_v31, %v300_v56  ;;  %v1240_v60 = vpop.f32.mrb[14].mxu0 }
  0xf7   :  { %1183 = vst [vmem:[#allocation2 + $0xa0] sm:$0xff] %v1122_v53   ;;  %v429_v61 = vadd.f32 %v1556_v31, %v428_v58  ;;  %v1272_v62 = vpop.f32.mrb[14].mxu1  ;;  %v312_v63 = vadd.f32 %v1240_v60, %v1556_v31  ;;  %v303_v0 = vpop.f32.mrb[15].mxu0  ;;  %v505_v7 = vmax.f32 %v309_v55, 0.0 }
  0xf8   :  { %v537_v1 = vmax.f32 %v437_v57, 0.0  ;;  %v440_v2 = vadd.f32 %v1272_v62, %v1556_v31  ;;  %v431_v3 = vpop.f32.mrb[15].mxu1  ;;  %v304_v4 = vadd.f32 %v1556_v31, %v303_v0  ;;  %v503_v10 = vmax.f32 %v301_v59, 0.0 }
  0xf9   :  { %v535_v5 = vmax.f32 %v429_v61, 0.0  ;;  %v432_v6 = vadd.f32 %v1556_v31, %v431_v3  ;;  %v506_v8 = vmax.f32 %v312_v63, 0.0 }
  0xfa   :  { %v538_v9 = vmax.f32 %v440_v2, 0.0  ;;  %v504_v11 = vmax.f32 %v304_v4, 0.0 }
  0xfb   :  { %v536_v12 = vmax.f32 %v432_v6, 0.0  ;;  %v1057_v13 = vpack.c.bf16 %v506_v8, %v505_v7 }
  0xfc   :  { %v1137_v14 = vpack.c.bf16 %v538_v9, %v537_v1  ;;  %v1052_v15 = vpack.c.bf16 %v504_v11, %v503_v10  ;;  %v1243_v16 = vpop.f32.mrb[16].mxu0 }
  0xfd   :  { %v1132_v17 = vpack.c.bf16 %v536_v12, %v535_v5  ;;  %v1275_v18 = vpop.f32.mrb[16].mxu1  ;;  %1170 = vst [vmem:[#allocation2 + $0x38] sm:$0xff] %v1057_v13   ;;  %v325_v19 = vadd.f32 %v1243_v16, %v1556_v31  ;;  %v316_v20 = vpop.f32.mrb[17].mxu0 }
  0xfe   :  { %1186 = vst [vmem:[#allocation2 + $0xb8] sm:$0xff] %v1137_v14   ;;  %v453_v21 = vadd.f32 %v1275_v18, %v1556_v31  ;;  %v444_v22 = vpop.f32.mrb[17].mxu1  ;;  %1169 = vst [vmem:[#allocation2 + $0x30] sm:$0xff] %v1052_v15   ;;  %v317_v23 = vadd.f32 %v1556_v31, %v316_v20  ;;  %v1244_v24 = vpop.f32.mrb[18].mxu0 }
  0xff   :  { %1185 = vst [vmem:[#allocation2 + $0xb0] sm:$0xff] %v1132_v17   ;;  %v445_v25 = vadd.f32 %v1556_v31, %v444_v22  ;;  %v1276_v26 = vpop.f32.mrb[18].mxu1  ;;  %v328_v27 = vadd.f32 %v1244_v24, %v1556_v31  ;;  %v319_v28 = vpop.f32.mrb[19].mxu0  ;;  %v509_v36 = vmax.f32 %v325_v19, 0.0 }
 0x100   :  { %v541_v29 = vmax.f32 %v453_v21, 0.0  ;;  %v456_v30 = vadd.f32 %v1276_v26, %v1556_v31  ;;  %v447_v32 = vpop.f32.mrb[19].mxu1  ;;  %v320_v33 = vadd.f32 %v1556_v31, %v319_v28  ;;  %v507_v39 = vmax.f32 %v317_v23, 0.0 }
 0x101   :  { %v539_v34 = vmax.f32 %v445_v25, 0.0  ;;  %v448_v35 = vadd.f32 %v1556_v31, %v447_v32  ;;  %v510_v37 = vmax.f32 %v328_v27, 0.0 }
 0x102   :  { %v542_v38 = vmax.f32 %v456_v30, 0.0  ;;  %v508_v40 = vmax.f32 %v320_v33, 0.0 }
 0x103   :  { %v540_v41 = vmax.f32 %v448_v35, 0.0  ;;  %v1067_v42 = vpack.c.bf16 %v510_v37, %v509_v36 }
 0x104   :  { %v1147_v43 = vpack.c.bf16 %v542_v38, %v541_v29  ;;  %v1062_v44 = vpack.c.bf16 %v508_v40, %v507_v39  ;;  %v1247_v45 = vpop.f32.mrb[20].mxu0 }
 0x105   :  { %v1142_v46 = vpack.c.bf16 %v540_v41, %v539_v34  ;;  %v1279_v47 = vpop.f32.mrb[20].mxu1  ;;  %1172 = vst [vmem:[#allocation2 + $0x48] sm:$0xff] %v1067_v42   ;;  %v341_v48 = vadd.f32 %v1247_v45, %v1556_v31  ;;  %v332_v49 = vpop.f32.mrb[21].mxu0 }
 0x106   :  { %1188 = vst [vmem:[#allocation2 + $0xc8] sm:$0xff] %v1147_v43   ;;  %v469_v50 = vadd.f32 %v1279_v47, %v1556_v31  ;;  %v460_v51 = vpop.f32.mrb[21].mxu1  ;;  %1171 = vst [vmem:[#allocation2 + $0x40] sm:$0xff] %v1062_v44   ;;  %v333_v52 = vadd.f32 %v1556_v31, %v332_v49  ;;  %v1248_v53 = vpop.f32.mrb[22].mxu0 }
 0x107   :  { %1187 = vst [vmem:[#allocation2 + $0xc0] sm:$0xff] %v1142_v46   ;;  %v461_v54 = vadd.f32 %v1556_v31, %v460_v51  ;;  %v1280_v55 = vpop.f32.mrb[22].mxu1  ;;  %v344_v56 = vadd.f32 %v1248_v53, %v1556_v31  ;;  %v335_v57 = vpop.f32.mrb[23].mxu0  ;;  %v513_v0 = vmax.f32 %v341_v48, 0.0 }
 0x108   :  { %v545_v58 = vmax.f32 %v469_v50, 0.0  ;;  %v472_v59 = vadd.f32 %v1280_v55, %v1556_v31  ;;  %v463_v60 = vpop.f32.mrb[23].mxu1  ;;  %v336_v61 = vadd.f32 %v1556_v31, %v335_v57  ;;  %v511_v3 = vmax.f32 %v333_v52, 0.0 }
 0x109   :  { %v543_v62 = vmax.f32 %v461_v54, 0.0  ;;  %v464_v63 = vadd.f32 %v1556_v31, %v463_v60  ;;  %v514_v1 = vmax.f32 %v344_v56, 0.0 }
 0x10a   :  { %v546_v2 = vmax.f32 %v472_v59, 0.0  ;;  %v512_v4 = vmax.f32 %v336_v61, 0.0 }
 0x10b   :  { %v544_v5 = vmax.f32 %v464_v63, 0.0  ;;  %v1077_v6 = vpack.c.bf16 %v514_v1, %v513_v0 }
 0x10c   :  { %v1157_v7 = vpack.c.bf16 %v546_v2, %v545_v58  ;;  %v1072_v8 = vpack.c.bf16 %v512_v4, %v511_v3  ;;  %v1251_v9 = vpop.f32.mrb[24].mxu0 }
 0x10d   :  { %v1152_v10 = vpack.c.bf16 %v544_v5, %v543_v62  ;;  %v1283_v11 = vpop.f32.mrb[24].mxu1  ;;  %1174 = vst [vmem:[#allocation2 + $0x58] sm:$0xff] %v1077_v6   ;;  %v357_v12 = vadd.f32 %v1251_v9, %v1556_v31  ;;  %v348_v13 = vpop.f32.mrb[25].mxu0 }
 0x10e   :  { %1190 = vst [vmem:[#allocation2 + $0xd8] sm:$0xff] %v1157_v7   ;;  %v485_v14 = vadd.f32 %v1283_v11, %v1556_v31  ;;  %v476_v15 = vpop.f32.mrb[25].mxu1  ;;  %1173 = vst [vmem:[#allocation2 + $0x50] sm:$0xff] %v1072_v8   ;;  %v349_v16 = vadd.f32 %v1556_v31, %v348_v13  ;;  %v1252_v17 = vpop.f32.mrb[26].mxu0 }
 0x10f   :  { %1189 = vst [vmem:[#allocation2 + $0xd0] sm:$0xff] %v1152_v10   ;;  %v477_v18 = vadd.f32 %v1556_v31, %v476_v15  ;;  %v1284_v19 = vpop.f32.mrb[26].mxu1  ;;  %v360_v20 = vadd.f32 %v1252_v17, %v1556_v31  ;;  %v351_v21 = vpop.f32.mrb[27].mxu0  ;;  %v517_v28 = vmax.f32 %v357_v12, 0.0 }
 0x110   :  { %v549_v22 = vmax.f32 %v485_v14, 0.0  ;;  %v488_v23 = vadd.f32 %v1284_v19, %v1556_v31  ;;  %v479_v24 = vpop.f32.mrb[27].mxu1  ;;  %v352_v25 = vadd.f32 %v1556_v31, %v351_v21  ;;  %v515_v33 = vmax.f32 %v349_v16, 0.0 }
 0x111   :  { %v547_v26 = vmax.f32 %v477_v18, 0.0  ;;  %v480_v27 = vadd.f32 %v1556_v31, %v479_v24  ;;  %v518_v29 = vmax.f32 %v360_v20, 0.0 }
 0x112   :  { %v1017_v30 = vpack.c.bf16 %v549_v22, %v549_v22  ;;  %v550_v32 = vmax.f32 %v488_v23, 0.0  ;;  %v516_v34 = vmax.f32 %v352_v25, 0.0 }
 0x113   :  { %v548_v35 = vmax.f32 %v480_v27, 0.0  ;;  %v1087_v36 = vpack.c.bf16 %v518_v29, %v517_v28 }
 0x114   :  { %849 = vst [vmem:[#allocation2 + $0xe8] sm:$0xf] %v1017_v30  ;;  %v1018_v37 = vpack.c.bf16 %v550_v32, %v550_v32  ;;  %v1082_v38 = vpack.c.bf16 %v516_v34, %v515_v33  ;;  %v1255_v39 = vpop.f32.mrb[28].mxu0 }
 0x115   :  { %v1162_v40 = vpack.c.bf16 %v548_v35, %v547_v26  ;;  %1176 = vst [vmem:[#allocation2 + $0x68] sm:$0xff] %v1087_v36   ;;  %v373_v41 = vadd.f32 %v1255_v39, %v1556_v31  ;;  %v364_v42 = vpop.f32.mrb[29].mxu0 }
 0x116   :  { %850 = vst [vmem:[#allocation2 + $0xec] sm:$0x3] %v1018_v37  ;;  %1175 = vst [vmem:[#allocation2 + $0x60] sm:$0xff] %v1082_v38   ;;  %v365_v43 = vadd.f32 %v1556_v31, %v364_v42  ;;  %v1256_v44 = vpop.f32.mrb[30].mxu0 }
 0x117   :  { %1191 = vst [vmem:[#allocation2 + $0xe0] sm:$0xff] %v1162_v40   ;;  %v376_v45 = vadd.f32 %v1256_v44, %v1556_v31  ;;  %v367_v46 = vpop.f32.mrb[31].mxu0  ;;  %v521_v48 = vmax.f32 %v373_v41, 0.0 }
 0x118   :  { %v368_v47 = vadd.f32 %v1556_v31, %v367_v46  ;;  %v519_v50 = vmax.f32 %v365_v43, 0.0 }
 0x119   :  { %v522_v49 = vmax.f32 %v376_v45, 0.0 }
 0x11a   :  { %v520_v51 = vmax.f32 %v368_v47, 0.0 }
 0x11b   :  { %v1097_v52 = vpack.c.bf16 %v522_v49, %v521_v48 }
 0x11c   :  { %v1092_v53 = vpack.c.bf16 %v520_v51, %v519_v50 }
 0x11d   :  { %1178 = vst [vmem:[#allocation2 + $0x78] sm:$0xff] %v1097_v52  }
 0x11e   :  { %1177 = vst [vmem:[#allocation2 + $0x70] sm:$0xff] %v1092_v53  }
 0x11f   :  { %1303 = shalt.err (!%p1300_p4)
}
 0x120   :  { %s1304_s26 = scalar_lea.hbm %s1633_s3, 3840 }
 0x121   :  { %p1305_p5 = scmp.ne.s32.totalorder %s1633_s3, %s1304_s26  ;;  %p1308_p6 = scmp.lt.u32.totalorder %s1304_s26, %s1633_s3 }
 0x123   :  { %p1310_p7 = pnand %p1308_p6, %p1305_p5 }
 0x125   :  { %1313 = shalt.err (!%p1310_p7)
}
 0x126   :  { %s1318_s4 = smov 64   ;;  %s1319_s5 = smov 4  }
 0x127   :  { %862 = dma.vmem_to_hbm [thread:$0]  %s857_s2, 3840, %s1633_s3, [#allocation3], %s1318_s4, %s1318_s4, %s1319_s5  }
 0x128   :  { %1314 = dma.done.wait [#allocation3], 3840  }
 0x129   :  { %1315 = vsyncadd [#allocation3], 4294963456 }
 0x12a   :  { %866 = vsyncpa [#allocation3], 1 }

</bundles_post_ra>
